<compile_context>
chip_gen: v7x
topology: tpu7x:2x2x1
jax: 0.10.0
libtpu: 0.0.40
codegen_flags: <defaults>
</compile_context>

<pallas_src>
import math

import jax
import jax.numpy as jnp
from jax.experimental import pallas as pl
from jax.experimental.pallas import tpu as pltpu


def _layer_scale_kernel(x_ref, gamma_ref, o_ref):
    # x_ref: (block_rows, lane_d) tile; gamma_ref: (1, lane_d), resident for
    # every grid step; broadcast multiply on the VPU.
    o_ref[...] = x_ref[...] * gamma_ref[...]


def _vmem_capacity_bytes() -> int:
    """Physical per-core VMEM bytes; conservative fallback = 64 MiB (v7x)."""
    try:
        cap = int(getattr(pltpu.get_tpu_info(), "vmem_capacity_bytes", 0))
        if cap > 0:
            return cap
    except Exception:
        pass
    return 64 * 1024 * 1024


def layer_scale(x: jax.Array, gamma: jax.Array, *, block_rows: int | None = None,
                donate_x: bool = False) -> jax.Array:
    """out = x * gamma, gamma broadcast along the last axis of x."""
    orig_shape = x.shape
    D = orig_shape[-1]
    assert gamma.shape == (D,), f"gamma must be ({D},), got {gamma.shape}"
    gamma = gamma.astype(x.dtype)

    rows = math.prod(orig_shape[:-1])  # == 1 for 1-D input
    itemsize = jnp.dtype(x.dtype).itemsize
    sublane = max(8, 32 // itemsize)          # f32: 8, bf16: 16, int8/fp8: 32

    # Lane-fold: if D is not a multiple of the 128-lane vreg width, fold
    # consecutive rows into the lane dimension up to lcm(D, 128) so stores are
    # lane-dense (unmasked vst).  gamma is tiled to match (pure layout change,
    # cheap at the XLA level).  Handles both D < 128 (e.g. 32 -> 128) and
    # D % 128 != 0 (e.g. 192 -> 384).
    lane_d, fold = D, 1
    if D % 128 != 0:
        lcm = math.lcm(D, 128)
        f = lcm // D
        if rows % f == 0 and lcm * itemsize <= (1 << 20):  # keep row width sane
            fold, lane_d = f, lcm
    rows2 = rows // fold
    x2 = x.reshape(rows2, lane_d)
    gamma_row = (jnp.tile(gamma, fold) if fold > 1 else gamma).reshape(1, lane_d)
    row_bytes = lane_d * itemsize

    # Generation-aware VMEM sizing.  limit_cap is the scoped-VMEM ceiling we
    # are willing to request (physical minus headroom for Mosaic internal
    # scratch, never above 96 MiB even on the 128 MiB parts); the 4-buffer tile
    # footprint budget is derived from it.
    phys = _vmem_capacity_bytes()
    limit_cap = max(32 << 20, min(phys - (12 << 20), 96 << 20))
    budget = min(limit_cap - (4 << 20), 64 << 20)     # 2x(in) + 2x(out) tile bytes

    # Biggest sublane-aligned row tile whose double-buffered in+out footprint
    # fits the budget.  No arbitrary row cap: the budget decides.
    max_block_rows = max(sublane, (budget // (4 * row_bytes)) // sublane * sublane)
    if block_rows is None:
        block_rows = max_block_rows
    else:
        block_rows = max(sublane, (block_rows // sublane) * sublane)
        block_rows = min(block_rows, max_block_rows)  # keep footprint <= limit
    # No taller than the (sublane-rounded) number of rows actually present.
    block_rows = min(block_rows, pl.cdiv(rows2, sublane) * sublane)

    grid = (pl.cdiv(rows2, block_rows),)              # ragged final block is masked

    # vmem_limit derived from the actual footprint -> always consistent with
    # the tile choice, and always <= limit_cap by construction above.
    block_bytes = block_rows * row_bytes
    vmem_limit = int(max(32 << 20,
                         min(limit_cap,
                             4 * block_bytes + 2 * lane_d * itemsize + (2 << 20))))

    extra = {"input_output_aliases": {0: 0}} if donate_x else {}

    out2 = pl.pallas_call(
        _layer_scale_kernel,
        out_shape=jax.ShapeDtypeStruct((rows2, lane_d), x.dtype),
        grid_spec=pltpu.PrefetchScalarGridSpec(
            num_scalar_prefetch=0,
            grid=grid,
            in_specs=[
                pl.BlockSpec((block_rows, lane_d), lambda i: (i, 0)),  # x tile
                pl.BlockSpec((1, lane_d), lambda i: (0, 0)),           # gamma, resident
            ],
            out_specs=pl.BlockSpec((block_rows, lane_d), lambda i: (i, 0)),
        ),
        compiler_params=pltpu.CompilerParams(
            dimension_semantics=("parallel",),  # shard rows across v7x's 2 TCs
            vmem_limit_bytes=vmem_limit,
        ),
        **extra,
    )(x2, gamma_row)

    return out2.reshape(orig_shape)


class LayerScaleParams:
    """Mirrors nn.Parameter(init_values * torch.ones(dim)); forward: x * gamma."""

    def __init__(self, dim: int, init_values: float = 1e-5, inplace: bool = False,
                 dtype=jnp.float32):
        self.gamma = init_values * jnp.ones((dim,), dtype=dtype)
        # `inplace` has no value-level effect; map it to output-buffer donation.
        # NOTE: with inplace=True the original x buffer must not be reused.
        self.inplace = inplace

    def __call__(self, x: jax.Array) -> jax.Array:
        return layer_scale(x, self.gamma, donate_x=self.inplace)


if __name__ == "__main__":
    # Case 1: small ViT-like shape, f32 (exercises the D<128 lane-fold path,
    # 32 -> 128 lanes).
    B, N, D = 2, 8, 32
    x = jax.random.normal(jax.random.PRNGKey(0), (B, N, D), dtype=jnp.float32)
    module = LayerScaleParams(dim=D, init_values=1e-5)
    out = jax.block_until_ready(module(x))
    ref = x * module.gamma
    assert out.shape == x.shape and out.dtype == x.dtype
    assert jnp.allclose(out, ref, rtol=1e-6, atol=0.0), "f32 mismatch vs reference"

    # Case 2: bf16 with a ragged row count (2*197 tokens) and D % 128 != 0
    # (exercises the generalized lcm lane-fold: 192 -> 384 lanes, bf16
    # sublane=16 tiling, and the masked final block).
    B2, N2, D2 = 2, 197, 192
    xb = jax.random.normal(jax.random.PRNGKey(1), (B2, N2, D2), dtype=jnp.bfloat16)
    mod2 = LayerScaleParams(dim=D2, init_values=1e-5, dtype=jnp.bfloat16)
    outb = jax.block_until_ready(mod2(xb))
    refb = xb * mod2.gamma
    assert outb.shape == xb.shape and outb.dtype == xb.dtype
    assert jnp.allclose(outb.astype(jnp.float32), refb.astype(jnp.float32),
                        rtol=2e-2, atol=1e-8), "bf16 mismatch vs reference"

    # Case 3: 2-D input with D a multiple of 128 (no fold, multi-row grid path
    # with an explicit small user block_rows to exercise the ragged grid).
    M3, D3 = 300, 256
    xc = jax.random.normal(jax.random.PRNGKey(2), (M3, D3), dtype=jnp.float32)
    gc = 1e-5 * jnp.ones((D3,), dtype=jnp.float32)
    outc = jax.block_until_ready(layer_scale(xc, gc, block_rows=128))
    assert jnp.allclose(outc, xc * gc, rtol=1e-6, atol=0.0), "grid-path mismatch"

    print("KERNEL_OK")
</pallas_src>

<mosaic_0001>
module attributes {stable_mosaic.version = 11 : i64} {
  func.func @_layer_scale_kernel(%arg0: i32, %arg1: memref<8x128xf32, #tpu.memory_space<vmem>>, %arg2: memref<1x128xf32, #tpu.memory_space<vmem>>, %arg3: memref<8x128xf32, #tpu.memory_space<vmem>>) attributes {dimension_semantics = [#tpu.dimension_semantics<parallel>], iteration_bounds = array<i64: 1>, scalar_prefetch = 0 : i64, scratch_operands = 0 : i64, tpu.core_type = #tpu.core_type<tc>, window_params = [{transform_indices = @transform_0, window_bounds = array<i64: 8, 128>}, {pipeline_mode = #tpu.pipeline_mode<synchronous>, transform_indices = @transform_1, window_bounds = array<i64: 1, 128>}, {transform_indices = @transform_2, window_bounds = array<i64: 8, 128>}]} {
    %c0 = arith.constant 0 : index
    %c0_0 = arith.constant 0 : index
    %0 = vector.load %arg1[%c0, %c0_0] : memref<8x128xf32, #tpu.memory_space<vmem>>, vector<8x128xf32>
    %c0_1 = arith.constant 0 : index
    %c0_2 = arith.constant 0 : index
    %1 = vector.load %arg2[%c0_1, %c0_2] : memref<1x128xf32, #tpu.memory_space<vmem>>, vector<1x128xf32>
    %2 = vector.broadcast %1 : vector<1x128xf32> to vector<8x128xf32>
    %3 = arith.mulf %0, %2 : vector<8x128xf32>
    %c0_3 = arith.constant 0 : index
    %c0_4 = arith.constant 0 : index
    %4 = vector.load %arg3[%c0_3, %c0_4] : memref<8x128xf32, #tpu.memory_space<vmem>>, vector<8x128xf32>
    tpu.vector_store %arg3[%c0_3, %c0_4], %3 {strides = array<i32>} : memref<8x128xf32, #tpu.memory_space<vmem>>, vector<8x128xf32>,
    return
  }
  func.func @transform_0(%arg0: i32) -> (i32, i32) {
    %c0_i32 = arith.constant 0 : i32
    %c0_i32_0 = arith.constant 0 : i32
    return %arg0, %c0_i32 : i32, i32
  }
  func.func @transform_1(%arg0: i32) -> (i32, i32) {
    %c0_i32 = arith.constant 0 : i32
    %c0_i32_0 = arith.constant 0 : i32
    %c0_i32_1 = arith.constant 0 : i32
    return %c0_i32, %c0_i32_0 : i32, i32
  }
  func.func @transform_2(%arg0: i32) -> (i32, i32) {
    %c0_i32 = arith.constant 0 : i32
    %c0_i32_0 = arith.constant 0 : i32
    return %arg0, %c0_i32 : i32, i32
  }
}

</mosaic_0001>

<bundles_post_ra>
// kernel: tpu_custom_call.1
= control target key start
LH: loop header
LB: loop body
LE: loop exit
PB: predicated region body
PF: predicated region fallthrough
CT: control target
= control target key end

     0   :  { %7 = vsyncpa [#allocation3], 0  ;;  %s152_s0 = inlined_call_operand.hbm [shape: f32[4,128], index: 0, kind: input, shape index: {}]   ;;  %s153_s1 = inlined_call_operand.vmem [shape: f32[1,128], index: 1, kind: input, shape index: {}]   ;;  %s154_s2 = inlined_call_operand.hbm [shape: f32[4,128], index: 2, kind: output, shape index: {}]  }
   0x1   :  { %8 = vsyncpa [#allocation4], 0 }
   0x2   :  { %13 = vsyncadd [#allocation3], 64  ;;  %s106_s9 = smov [#allocation2]   ;;  %s58_s13 = scalar_lea.hbm %s152_s0, 64 }
   0x3   :  { %s14_s10 = sshll.u32 %s106_s9, 4  ;;  %p59_p0 = scmp.ne.s32.totalorder %s152_s0, %s58_s13  ;;  %s15_s10 = int_to_ptr.vmem [resolvable:$true] %s14_s10 }
   0x4   :  { %p62_p1 = scmp.lt.u32.totalorder %s58_s13, %s152_s0 }
   0x6   :  { %p64_p2 = pnand %p62_p1, %p59_p0 }
   0x8   :  { %67 = shalt.err (!%p64_p2)
}
   0x9   :  { %s68_s18 = scalar_lea.vmem %s15_s10, 64  ;;  %s72_s19 = scalar_lea.vmem %s15_s10, 128 }
   0xa   :  { %p69_p3 = scmp.ne.s32.totalorder %s15_s10, %s68_s18  ;;  %p73_p4 = scmp.lt.s32.totalorder %s15_s10, %s15_s10 }
   0xb   :  { %p74_p5 = scmp.lt.s32.totalorder %s72_s19, %s68_s18 }
   0xd   :  { %p75_p6 = por %p74_p5, %p73_p4 }
   0xf   :  { %p76_p7 = pnand %p75_p6, %p69_p3 }
  0x11   :  { %79 = shalt.err (!%p76_p7)
}
  0x12   :  { %s107_s20 = smov 64   ;;  %s108_s21 = smov 4  }
  0x13   :  { %20 = dma.hbm_to_vmem [thread:$0]  %s152_s0, 64, %s15_s10, [#allocation3], %s107_s20, %s107_s20, %s108_s21  }
  0x14   :  { %102 = dma.done.wait [#allocation3], 128  }
  0x15   :  { %103 = vsyncadd [#allocation3], 4294967168  ;;  %v26_v0 = vld [vmem:[#allocation2] sm:$0xff] }
  0x16   :  { %v53_v1 = vld [vmem:[%s153_s1] ss:$0 sm:$0xff] }
  0x17   :  { %v34_v2 = vmul.f32 %v53_v1, %v26_v0 }
  0x19   :  { %35 = vst [vmem:[#allocation5] sm:$0xff] %v34_v2 }
  0x1a   :  { %40 = vsyncadd [#allocation4], 64  ;;  %s109_s26 = smov [#allocation5]  }
  0x1b   :  { %s41_s27 = sshll.u32 %s109_s26, 4  ;;  %s42_s27 = int_to_ptr.vmem [resolvable:$true] %s41_s27 }
  0x1c   :  { %s80_s28 = scalar_lea.vmem %s42_s27, 64  ;;  %s84_s29 = scalar_lea.vmem %s42_s27, 128 }
  0x1d   :  { %p81_p8 = scmp.ne.s32.totalorder %s42_s27, %s80_s28  ;;  %p85_p9 = scmp.lt.s32.totalorder %s42_s27, %s42_s27 }
  0x1e   :  { %p86_p10 = scmp.lt.s32.totalorder %s84_s29, %s80_s28 }
  0x20   :  { %p87_p11 = por %p86_p10, %p85_p9 }
  0x22   :  { %p88_p12 = pnand %p87_p11, %p81_p8 }
  0x24   :  { %91 = shalt.err (!%p88_p12)
}
  0x25   :  { %s92_s3 = scalar_lea.hbm %s154_s2, 64 }
  0x26   :  { %p93_p13 = scmp.ne.s32.totalorder %s154_s2, %s92_s3  ;;  %p96_p0 = scmp.lt.u32.totalorder %s92_s3, %s154_s2 }
  0x28   :  { %p98_p1 = pnand %p96_p0, %p93_p13 }
  0x2a   :  { %101 = shalt.err (!%p98_p1)
}
  0x2b   :  { %47 = dma.vmem_to_hbm [thread:$0]  %s42_s27, 64, %s154_s2, [#allocation4], %s107_s20, %s107_s20, %s108_s21  }
  0x2c   :  { %104 = dma.done.wait [#allocation4], 128  }
  0x2d   :  { %105 = vsyncadd [#allocation4], 4294967168 }
  0x2e   :  { %51 = vsyncpa [#allocation3], 1 }
  0x2f   :  { %52 = vsyncpa [#allocation4], 1 }

</bundles_post_ra>
